<compile_context>
chip_gen: v7x
topology: tpu7x:2x2x1
jax: 0.10.0
libtpu: 0.0.40
codegen_flags: <defaults>
</compile_context>

<pallas_src>
import jax
import jax.numpy as jnp
from jax.experimental import pallas as pl
from jax.experimental.pallas import tpu as pltpu

ALPHA = 0.9
CLIP_EPS = 0.2   # unused in forward; kept for parity with the module
EPS = 1e-8

# Below ~1M elements (a few MB of HBM traffic ~ a few us) XLA's fused
# elementwise graph beats pallas_call launch + pipeline warm-up.
_MIN_PALLAS_ELEMS = 1 << 20


def _round_up(x, m):
    return ((x + m - 1) // m) * m


def _vmem_capacity_bytes():
    """Physical per-core VMEM; conservative (v7x = 64 MiB) default if the query fails."""
    try:
        return int(pltpu.get_tpu_info().vmem_capacity_bytes)
    except Exception:
        return 64 << 20


def _kl_variance_kernel(log_pavg_ref, logp_ref, old_logp_ref, mask_ref,
                        out_ref, num_acc, den_acc):
    """One (TB, TS) tile: exp/mul + masked row-sums into f32 running accumulators.

    log_pavg_ref : SMEM (1, 1) f32  -- precomputed log(clamp(probs_average, eps))
    logp_ref     : VMEM (TB, TS) native dtype (e.g. bf16)
    old_logp_ref : VMEM (TB, TS) native dtype
    mask_ref     : VMEM (TB, TS) int8 (0/1 values)
    out_ref      : VMEM (TB, 1)  f32 -- per-row masked mean (written at last k)
    num_acc/den_acc : VMEM (TB, 1) f32 scratch, carried across the seq axis
    """
    k = pl.program_id(1)

    @pl.when(k == 0)
    def _init():
        num_acc[...] = jnp.zeros_like(num_acc)
        den_acc[...] = jnp.zeros_like(den_acc)

    # Upcast on load; compute in f32 (the bandwidth win is the bf16/int8 DMA).
    lp = logp_ref[...].astype(jnp.float32)
    olp = old_logp_ref[...].astype(jnp.float32)
    m = mask_ref[...].astype(jnp.float32)

    ratio = jnp.exp(lp - olp)                       # EUP exp
    term = ratio * (lp - log_pavg_ref[0, 0])        # VPU, scalar broadcast from SMEM

    num_acc[...] += jnp.sum(term * m, axis=-1, keepdims=True)   # XLU reduce
    den_acc[...] += jnp.sum(m, axis=-1, keepdims=True)

    @pl.when(k == pl.num_programs(1) - 1)
    def _finalize():
        # Single divide per batch tile, off the hot per-tile loop.
        # (No den==0 guard, matching the PyTorch reference; padded dummy rows
        #  produce NaN here but are sliced off before the batch mean.)
        out_ref[...] = num_acc[...] / den_acc[...]


def _choose_tiles(B32, S, per_elem_bytes, input_budget):
    """Pick (tb, ts): tb multiple of 32 (int8 mask min tile), ts multiple of 128,
    double-buffered 3-input footprint <= input_budget, grid[0] >= 2 when B allows."""
    if S <= 2048:
        ts = _round_up(S, 128)          # single lane block for small/medium S
    elif S % 2048 == 0:
        ts = 2048
    elif S % 1024 == 0:
        ts = 1024
    else:
        ts = 512                        # ragged large S: pad up to 512-multiple
    tb = 32
    for cand in (1024, 512, 256, 128, 64, 32):
        if B32 % cand != 0:
            continue
        if 2 * cand * ts * per_elem_bytes > input_budget:   # 2 pipeline buffers
            continue
        if cand * 2 <= B32 or B32 <= 32:   # keep grid[0] >= 2 (v7x megacore)
            tb = cand
            break
    return tb, ts


def _kl_variance_jax(log_probs, old_log_probs, mask, log_pavg):
    """Identical math in plain JAX, for tiny shapes."""
    lp = log_probs.astype(jnp.float32)
    olp = old_log_probs.astype(jnp.float32)
    m = mask.astype(jnp.float32)
    term = jnp.exp(lp - olp) * (lp - log_pavg)
    per_row = (term * m).sum(-1) / m.sum(-1)
    return per_row.mean()


def kl_variance_forward(log_probs, old_log_probs, action_mask, p_buffer, step,
                        alpha=ALPHA, eps=EPS, block_b=None, block_s=None):
    """KL_Variance.forward: scalar buffer math in JAX glue, [B,S] hot path in Pallas."""
    B, S = log_probs.shape

    # Glue: probs_average = p / (1 - alpha**step); clamp(min=eps); log.
    # TODO(synk): after update_probs the buffer p becomes [B, S]-shaped; that case
    # needs log_pavg as a fourth tiled VMEM input instead of an SMEM scalar.
    probs_average = p_buffer.astype(jnp.float32) / (1.0 - jnp.float32(alpha) ** step)
    log_pavg = jnp.log(jnp.maximum(probs_average, jnp.float32(eps)))
    log_pavg = jnp.reshape(log_pavg, (-1,))[0].reshape(1, 1)

    forced = (block_b is not None) and (block_s is not None)

    # Tiny shapes: dispatch overhead > data movement -> pure JAX (unless forced).
    if not forced and (B * S < _MIN_PALLAS_ELEMS):
        return _kl_variance_jax(log_probs, old_log_probs, action_mask, log_pavg[0, 0])

    # Mask as 1-byte lanes: drops total traffic from 6 to 5 bytes/elem.
    if action_mask.dtype in (jnp.int8, jnp.uint8):
        mask_i8 = action_mask
    else:
        mask_i8 = (action_mask != 0).astype(jnp.int8)

    itemsize = jnp.dtype(log_probs.dtype).itemsize
    per_elem = 2 * itemsize + 1                      # two log tensors + int8 mask

    vmem_cap = _vmem_capacity_bytes()
    input_budget = min(24 << 20, vmem_cap // 3)      # double-buffered input footprint cap

    if forced:
        tb = _round_up(int(block_b), 32)             # int8 min tile is (32, 128)
        ts = _round_up(int(block_s), 128)
        if 2 * tb * ts * per_elem > input_budget:    # VMEM-fit guard on explicit blocks
            tb, ts = _choose_tiles(_round_up(B, 32), S, per_elem, input_budget)
    else:
        tb, ts = _choose_tiles(_round_up(B, 32), S, per_elem, input_budget)

    # Pad ragged shapes up to the tile grid with mask = 0 (exact: 0 added to num/den;
    # dummy rows are dropped before the batch mean).
    B_pad = _round_up(B, tb)
    S_pad = _round_up(S, ts)
    if B_pad != B or S_pad != S:
        pw = ((0, B_pad - B), (0, S_pad - S))
        log_probs_k = jnp.pad(log_probs, pw)
        old_log_probs_k = jnp.pad(old_log_probs, pw)
        mask_k = jnp.pad(mask_i8, pw)
    else:
        log_probs_k, old_log_probs_k, mask_k = log_probs, old_log_probs, mask_i8

    grid = (B_pad // tb, S_pad // ts)                # reduction (sequence) axis last

    # Request enough scoped VMEM for the pipeline (v5e default is only 16 MiB)
    # but never more than 3/4 of physical VMEM (v7x has 64 MiB per core).
    footprint = 2 * tb * ts * per_elem + 2 * tb * 4 + 2 * tb * 4
    vmem_limit = int(min(max(2 * footprint, 32 << 20), (vmem_cap * 3) // 4))

    cost = pl.CostEstimate(
        flops=6 * B_pad * S_pad,
        transcendentals=B_pad * S_pad,
        bytes_accessed=per_elem * B_pad * S_pad + 4 * B_pad)

    per_row = pl.pallas_call(
        _kl_variance_kernel,
        out_shape=jax.ShapeDtypeStruct((B_pad, 1), jnp.float32),
        grid=grid,
        in_specs=[
            pl.BlockSpec(memory_space=pltpu.MemorySpace.SMEM),        # log_pavg scalar
            pl.BlockSpec((tb, ts), lambda i, k: (i, k)),              # log_probs
            pl.BlockSpec((tb, ts), lambda i, k: (i, k)),              # old_log_probs
            pl.BlockSpec((tb, ts), lambda i, k: (i, k)),              # action_mask (int8)
        ],
        out_specs=pl.BlockSpec((tb, 1), lambda i, k: (i, 0)),
        scratch_shapes=[pltpu.VMEM((tb, 1), jnp.float32),             # num accumulator
                        pltpu.VMEM((tb, 1), jnp.float32)],            # den accumulator
        compiler_params=pltpu.CompilerParams(
            dimension_semantics=("parallel", "arbitrary"),
            vmem_limit_bytes=vmem_limit),
        cost_estimate=cost,
    )(log_pavg, log_probs_k, old_log_probs_k, mask_k)

    return jnp.mean(per_row[:B, 0])   # drop padded rows; final .mean() over batch


def _reference(log_probs, old_log_probs, action_mask, p_buffer, step,
               alpha=ALPHA, eps=EPS):
    lp = log_probs.astype(jnp.float32)
    olp = old_log_probs.astype(jnp.float32)
    m = action_mask.astype(jnp.float32)
    ratio = jnp.exp(lp - olp)
    probs_average = p_buffer.astype(jnp.float32) / (1.0 - alpha ** step)
    term = ratio * (lp - jnp.log(jnp.maximum(probs_average, eps)))
    mm = (term * m).sum(-1) / m.sum(-1)
    return mm.mean()


if __name__ == "__main__":
    key = jax.random.PRNGKey(0)

    def make_inputs(B, S, k):
        k1, k2, k3 = jax.random.split(k, 3)
        lp = (-jax.nn.softplus(
            jax.random.normal(k1, (B, S), jnp.float32))).astype(jnp.bfloat16)
        olp = (-jax.nn.softplus(
            jax.random.normal(k2, (B, S), jnp.float32))).astype(jnp.bfloat16)
        m = (jax.random.uniform(k3, (B, S)) > 0.3)
        m = m.at[:, 0].set(True)          # no empty rows
        return lp, olp, m.astype(jnp.int8)

    # Module buffers, initialized as in __init__ (deterministic, no checkpoint).
    p_buffer = jnp.zeros((1,), jnp.float32)   # register_buffer('p', torch.zeros(1))
    step = 1                                  # self.step = 1

    # Test 1: aligned shape, explicit blocks -> Pallas path, grid (2, 2).
    lp, olp, m = make_inputs(64, 1024, jax.random.fold_in(key, 0))
    out = jax.block_until_ready(kl_variance_forward(
        lp, olp, m, p_buffer, step, block_b=32, block_s=512))
    ref = _reference(lp, olp, m, p_buffer, step)
    assert jnp.allclose(out, ref, rtol=1e-4, atol=1e-4), (out, ref)

    # Test 2: ragged shape -> pad-and-mask Pallas path (B 40->64, S 1000->1024).
    lp2, olp2, m2 = make_inputs(40, 1000, jax.random.fold_in(key, 1))
    out2 = jax.block_until_ready(kl_variance_forward(
        lp2, olp2, m2, p_buffer, step, block_b=32, block_s=512))
    ref2 = _reference(lp2, olp2, m2, p_buffer, step)
    assert jnp.allclose(out2, ref2, rtol=1e-4, atol=1e-4), (out2, ref2)

    # Test 3: tiny shape -> pure-JAX fallback path.
    lp3, olp3, m3 = make_inputs(8, 128, jax.random.fold_in(key, 2))
    out3 = jax.block_until_ready(kl_variance_forward(lp3, olp3, m3, p_buffer, step))
    ref3 = _reference(lp3, olp3, m3, p_buffer, step)
    assert jnp.allclose(out3, ref3, rtol=1e-4, atol=1e-4), (out3, ref3)

    print("KERNEL_OK")
</pallas_src>

<mosaic_0001>
module attributes {stable_mosaic.version = 11 : i64} {
  func.func @_kl_variance_kernel(%arg0: i32, %arg1: i32, %arg2: memref<1x1xf32, #tpu.memory_space<smem>>, %arg3: memref<32x512xbf16, #tpu.memory_space<vmem>>, %arg4: memref<32x512xbf16, #tpu.memory_space<vmem>>, %arg5: memref<32x512xi8, #tpu.memory_space<vmem>>, %arg6: memref<32x1xf32, #tpu.memory_space<vmem>>, %arg7: memref<32x1xf32, #tpu.memory_space<vmem>>, %arg8: memref<32x1xf32, #tpu.memory_space<vmem>>) attributes {dimension_semantics = [#tpu.dimension_semantics<parallel>, #tpu.dimension_semantics<arbitrary>], iteration_bounds = array<i64: 2, 2>, scalar_prefetch = 0 : i64, scratch_operands = 2 : i64, tpu.core_type = #tpu.core_type<tc>, window_params = [{transform_indices = @transform_0, window_bounds = array<i64: 1, 1>}, {transform_indices = @transform_1, window_bounds = array<i64: 32, 512>}, {transform_indices = @transform_2, window_bounds = array<i64: 32, 512>}, {transform_indices = @transform_3, window_bounds = array<i64: 32, 512>}, {transform_indices = @transform_4, window_bounds = array<i64: 32, 1>}]} {
    %c0_i32 = arith.constant 0 : i32
    %0 = arith.cmpi eq, %arg1, %c0_i32 : i32
    %1 = arith.extui %0 : i1 to i32
    %c0_i32_0 = arith.constant 0 : i32
    %2 = arith.cmpi ne, %1, %c0_i32_0 : i32
    scf.if %2 {
      %cst_18 = arith.constant 0.000000e+00 : f32
      %29 = vector.broadcast %cst_18 : f32 to vector<32x1xf32>
      %c0_19 = arith.constant 0 : index
      %c0_20 = arith.constant 0 : index
      %30 = vector.load %arg7[%c0_19, %c0_20] : memref<32x1xf32, #tpu.memory_space<vmem>>, vector<32x1xf32>
      tpu.vector_store %arg7[%c0_19, %c0_20], %29 {strides = array<i32>} : memref<32x1xf32, #tpu.memory_space<vmem>>, vector<32x1xf32>,
      %cst_21 = arith.constant 0.000000e+00 : f32
      %31 = vector.broadcast %cst_21 : f32 to vector<32x1xf32>
      %c0_22 = arith.constant 0 : index
      %c0_23 = arith.constant 0 : index
      %32 = vector.load %arg8[%c0_22, %c0_23] : memref<32x1xf32, #tpu.memory_space<vmem>>, vector<32x1xf32>
      tpu.vector_store %arg8[%c0_22, %c0_23], %31 {strides = array<i32>} : memref<32x1xf32, #tpu.memory_space<vmem>>, vector<32x1xf32>,
    } else {
    }
    %c0 = arith.constant 0 : index
    %c0_1 = arith.constant 0 : index
    %3 = vector.load %arg3[%c0, %c0_1] : memref<32x512xbf16, #tpu.memory_space<vmem>>, vector<32x512xbf16>
    %4 = arith.extf %3 : vector<32x512xbf16> to vector<32x512xf32>
    %c0_2 = arith.constant 0 : index
    %c0_3 = arith.constant 0 : index
    %5 = vector.load %arg4[%c0_2, %c0_3] : memref<32x512xbf16, #tpu.memory_space<vmem>>, vector<32x512xbf16>
    %6 = arith.extf %5 : vector<32x512xbf16> to vector<32x512xf32>
    %c0_4 = arith.constant 0 : index
    %c0_5 = arith.constant 0 : index
    %7 = vector.load %arg5[%c0_4, %c0_5] : memref<32x512xi8, #tpu.memory_space<vmem>>, vector<32x512xi8>
    %8 = arith.sitofp %7 : vector<32x512xi8> to vector<32x512xf32>
    %9 = arith.subf %4, %6 : vector<32x512xf32>
    %10 = math.exp %9 : vector<32x512xf32>
    %c0_6 = arith.constant 0 : index
    %c0_7 = arith.constant 0 : index
    %11 = memref.load %arg2[%c0_6, %c0_7] : memref<1x1xf32, #tpu.memory_space<smem>>
    %12 = vector.broadcast %11 : f32 to vector<32x512xf32>
    %13 = arith.subf %4, %12 : vector<32x512xf32>
    %14 = arith.mulf %10, %13 : vector<32x512xf32>
    %c0_8 = arith.constant 0 : index
    %c0_9 = arith.constant 0 : index
    %15 = vector.load %arg7[%c0_8, %c0_9] : memref<32x1xf32, #tpu.memory_space<vmem>>, vector<32x1xf32>
    %16 = arith.mulf %14, %8 : vector<32x512xf32>
    %cst = arith.constant dense<0.000000e+00> : vector<32xf32>
    %17 = vector.multi_reduction <add>, %16, %cst [1] : vector<32x512xf32> to vector<32xf32>
    %18 = vector.shape_cast %17 : vector<32xf32> to vector<32x1xf32>
    %19 = arith.addf %15, %18 : vector<32x1xf32>
    %c0_10 = arith.constant 0 : index
    %c0_11 = arith.constant 0 : index
    %20 = vector.load %arg7[%c0_10, %c0_11] : memref<32x1xf32, #tpu.memory_space<vmem>>, vector<32x1xf32>
    tpu.vector_store %arg7[%c0_10, %c0_11], %19 {strides = array<i32>} : memref<32x1xf32, #tpu.memory_space<vmem>>, vector<32x1xf32>,
    %c0_12 = arith.constant 0 : index
    %c0_13 = arith.constant 0 : index
    %21 = vector.load %arg8[%c0_12, %c0_13] : memref<32x1xf32, #tpu.memory_space<vmem>>, vector<32x1xf32>
    %cst_14 = arith.constant dense<0.000000e+00> : vector<32xf32>
    %22 = vector.multi_reduction <add>, %8, %cst_14 [1] : vector<32x512xf32> to vector<32xf32>
    %23 = vector.shape_cast %22 : vector<32xf32> to vector<32x1xf32>
    %24 = arith.addf %21, %23 : vector<32x1xf32>
    %c0_15 = arith.constant 0 : index
    %c0_16 = arith.constant 0 : index
    %25 = vector.load %arg8[%c0_15, %c0_16] : memref<32x1xf32, #tpu.memory_space<vmem>>, vector<32x1xf32>
    tpu.vector_store %arg8[%c0_15, %c0_16], %24 {strides = array<i32>} : memref<32x1xf32, #tpu.memory_space<vmem>>, vector<32x1xf32>,
    %c1_i32 = arith.constant 1 : i32
    %26 = arith.cmpi eq, %arg1, %c1_i32 : i32
    %27 = arith.extui %26 : i1 to i32
    %c0_i32_17 = arith.constant 0 : i32
    %28 = arith.cmpi ne, %27, %c0_i32_17 : i32
    scf.if %28 {
      %c0_18 = arith.constant 0 : index
      %c0_19 = arith.constant 0 : index
      %29 = vector.load %arg7[%c0_18, %c0_19] : memref<32x1xf32, #tpu.memory_space<vmem>>, vector<32x1xf32>
      %c0_20 = arith.constant 0 : index
      %c0_21 = arith.constant 0 : index
      %30 = vector.load %arg8[%c0_20, %c0_21] : memref<32x1xf32, #tpu.memory_space<vmem>>, vector<32x1xf32>
      %31 = arith.divf %29, %30 : vector<32x1xf32>
      %c0_22 = arith.constant 0 : index
      %c0_23 = arith.constant 0 : index
      %32 = vector.load %arg6[%c0_22, %c0_23] : memref<32x1xf32, #tpu.memory_space<vmem>>, vector<32x1xf32>
      tpu.vector_store %arg6[%c0_22, %c0_23], %31 {strides = array<i32>} : memref<32x1xf32, #tpu.memory_space<vmem>>, vector<32x1xf32>,
    } else {
    }
    return
  }
  func.func @transform_0(%arg0: i32, %arg1: i32) -> (i32, i32) {
    %c0_i32 = arith.constant 0 : i32
    %c0_i32_0 = arith.constant 0 : i32
    %c0_i32_1 = arith.constant 0 : i32
    return %c0_i32, %c0_i32_0 : i32, i32
  }
  func.func @transform_1(%arg0: i32, %arg1: i32) -> (i32, i32) {
    %c0_i32 = arith.constant 0 : i32
    return %arg0, %arg1 : i32, i32
  }
  func.func @transform_2(%arg0: i32, %arg1: i32) -> (i32, i32) {
    %c0_i32 = arith.constant 0 : i32
    return %arg0, %arg1 : i32, i32
  }
  func.func @transform_3(%arg0: i32, %arg1: i32) -> (i32, i32) {
    %c0_i32 = arith.constant 0 : i32
    return %arg0, %arg1 : i32, i32
  }
  func.func @transform_4(%arg0: i32, %arg1: i32) -> (i32, i32) {
    %c0_i32 = arith.constant 0 : i32
    %c0_i32_0 = arith.constant 0 : i32
    return %arg0, %c0_i32 : i32, i32
  }
}

</mosaic_0001>

<bundles_post_ra>
// kernel: tpu_custom_call.1
= control target key start
LH: loop header
LB: loop body
LE: loop exit
PB: predicated region body
PF: predicated region fallthrough
CT: control target
= control target key end

     0   :  { %s1500_s0 = inlined_call_operand.<no memory space> [shape: f32[1,1], index: 0, kind: input, shape index: {}]   ;;  %s1501_s1 = inlined_call_operand.hbm [shape: bf16[64,1024], index: 1, kind: input, shape index: {}]   ;;  %s1502_s2 = inlined_call_operand.hbm [shape: bf16[64,1024], index: 2, kind: input, shape index: {}]   ;;  %s1503_s3 = inlined_call_operand.hbm [shape: s8[64,1024], index: 3, kind: input, shape index: {}]   ;;  %s1504_s4 = inlined_call_operand.vmem [shape: f32[64,1], index: 4, kind: output, shape index: {}]  }
   0x1   :  { %1514 = sst [smem:[#allocation17_spill]] %s1501_s1 }
   0x2   :  { %1515 = sst [smem:[#allocation18_spill]] %s1502_s2 }
   0x3   :  { %1516 = sst [smem:[#allocation19_spill]] %s1504_s4 }
   0x4   :  { %9 = sst [smem:[#allocation4]] %s1500_s0 }
   0x5   :  { %10 = vsyncpa [#allocation6], 0 }
   0x6   :  { %12 = vsyncpa [#allocation6 + $0x1], 0 }
   0x7   :  { %13 = vsyncpa [#allocation8], 0 }
   0x8   :  { %15 = vsyncpa [#allocation8 + $0x1], 0  ;;  %s1093_s17 = smov 0   ;;  %s1095_s18 = smov 0  }
   0x9   :  { %s1097_s19 = smov 0   ;;  %s1099_s20 = smov 0  }
   0xa   :  { %s1101_s21 = smov 0   ;;  %s1103_s22 = smov 0  }
   0xb   :  { %s1105_s23 = smov 0   ;;  %s1107_s24 = smov 0  }
   0xc LB: > { %1517 = sst [smem:[#allocation12_spill]] %s1036_s19  ;;  %s1505_s0 = sadd.s32 4294967295, %s1056_s24   ;;  %s1056_s24 = sphi %s1107_s24, %s21_s24   ;;  %s1052_s23 = sphi %s1105_s23, %s1549_s23   ;;  %s1048_s22 = sphi %s1103_s22, %s1548_s22   ;;  %s1044_s21 = sphi %s1101_s21, %s1547_s21   ;;  %s1040_s20 = sphi %s1099_s20, %s1546_s20   ;;  %s1036_s19 = sphi %s1097_s19, %s1541_s19   ;;  %s1032_s18 = sphi %s1095_s18, %s1545_s18   ;;  %s1028_s17 = sphi %s1093_s17, %s1544_s17  }
   0xd   : > { %1518 = sst [smem:[#allocation13_spill]] %s1040_s20  ;;  %s30_s25 = sadd.s32 1, %s1048_s22 }
   0xe   : > { %p31_p0 = scmp.ge.s32.totalorder %s30_s25, 2  ;;  %s33_s26 = sadd.s32 1, %s1052_s23 }
   0xf   : > { %s63_s27 = sadd.s32 1, %s1036_s19  ;;  %p70_p1 = scmp.ne.s32.totalorder %s1036_s19, %s1032_s18 }
  0x10   : > { %s1551_s25 = smov (%p31_p0, %s30_s25), 0  ;;  %s1553_s26 = smov (!%p31_p0, %s33_s26), %s1052_s23 }
  0x11   : > { %1519 = sst [smem:[#allocation14_spill]] %s1551_s25  ;;  %s59_s28 = ssub.s32 %s1048_s22, %s1551_s25 }
  0x12   : > { %p71_p2 = scmp.eq.s32.totalorder %s1056_s24, 0  ;;  %p35_p3 = scmp.ge.s32.totalorder %s1553_s26, 2 }
  0x13   : > { %p76_p4 = scmp.ne.s32.totalorder %s1032_s18, %s1028_s17  ;;  %p77_p6 = scmp.eq.s32.totalorder %s1505_s0, 0 }
  0x14   : > { %p1144_p5 = por %p71_p2, %p70_p1  ;;  %s1555_s26 = smov (%p35_p3, %s1553_s26), 0 }
  0x15   : > { %1521 = sst [smem:[#allocation15_spill]] %s1555_s26  ;;  %p1152_p7 = por %p77_p6, %p76_p4 }
  0x16   : > { %s58_s5 = ssub.s32 %s1052_s23, %s1555_s26  ;;  %p787_p8 = scmp.lt.s32.totalorder %s1056_s24, 4 }
  0x17   : > { %s1522_s30 = scalar_select %p1152_p7, 1, 0 }
  0x18   : > { %s60_s6 = sor.u32 %s59_s28, %s58_s5  ;;  %s1160_s7 = sand.u32 1, %s1036_s19  }
  0x19   : > { %p61_p9 = scmp.eq.s32.totalorder %s60_s6, 0  ;;  %s745_s8 = sshll.u32 %s1160_s7, 6 }
  0x1a   : > { %s1506_s9 = sshll.u32 %s1048_s22, 2  ;;  %s769_s10 = sshll.u32 %s1052_s23, 5 }
  0x1b   : > { %s1166_s11 = scalar_select %p61_p9, %s1036_s19, %s63_s27  }
  0x1c   : > { %s1170_s12 = sadd.s32 %s769_s10, %s1506_s9  ;;  %p1174_p10 = pnand %p787_p8, %p1144_p5 }
  0x1d   : > { %1523 = sst [smem:[#allocation16_spill]] %s1166_s11  ;;  %s749_s14 = sshll.u32 %s1170_s12, 6 }
  0x1e   : > { %s1524_s13 = scalar_select %p1174_p10, 1, 0 }
  0x1f   : > { %s209_s15 = sand.u32 1, %s1056_s24   ;;  %s1525_s2 = sld [smem:[#allocation18_spill]] }
  0x20   : > { %s213_s27 = scalar_lea.vmem [#allocation7], %s745_s8  ;;  %s1192_s5 = scalar_lea.sflag [#allocation8], %s209_s15 }
  0x21   : > { %s223_s29 = sshll.u32 %s213_s27, 4  ;;  %p1198_p13 = pneg %p1174_p10  ;;  %s1189_s29 = int_to_ptr.vmem [resolvable:$true] %s223_s29 }
  0x25   : > { %s1185_s28 = scalar_lea.hbm %s1525_s2, %s749_s14  ;;  %s901_s27 = scalar_lea.hbm %s1525_s2, 4096 }
  0x26   : > { %s896_s6 = scalar_lea.hbm %s1185_s28, 1024  ;;  %p902_p2 = scmp.lt.u32.totalorder %s1185_s28, %s1525_s2 }
  0x27   : > { %p897_p12 = scmp.ne.s32.totalorder %s1185_s28, %s896_s6  ;;  %p903_p3 = scmp.lt.u32.totalorder %s901_s27, %s896_s6 }
  0x28   : > { %p905_p5 = scmp.lt.u32.totalorder %s896_s6, %s1185_s28 }
  0x29   : > { %p899_p0 = pnand %p1198_p13, %p897_p12  ;;  %p904_p4 = por %p903_p3, %p902_p2 }
  0x2b   : > { %p900_p1 = pneg %p899_p0  ;;  %p906_p6 = por %p905_p5, %p904_p4 }
  0x2d   : > { %p907_p8 = pnand %p906_p6, %p900_p1 }
  0x2f   : > { %910 = shalt.err (!%p907_p8)
}
  0x30   : > { %s911_s15 = scalar_lea.vmem %s1189_s29, 1024  ;;  %s1058_s16 = smov [#allocation7]  }
  0x31   : > { %p912_p9 = scmp.ne.s32.totalorder %s1189_s29, %s911_s15  ;;  %s916_s17 = sshll.u32 %s1058_s16, 4  ;;  %s917_s17 = int_to_ptr.vmem [resolvable:$false] %s916_s17 }
  0x32   : > { %s918_s0 = scalar_lea.vmem %s917_s17, 2048  ;;  %p919_p11 = scmp.lt.s32.totalorder %s1189_s29, %s917_s17 }
  0x33   : > { %p914_p12 = pnand %p912_p9, %p1198_p13  ;;  %p920_p7 = scmp.lt.s32.totalorder %s918_s0, %s911_s15 }
  0x35   : > { %p915_p0 = pneg %p914_p12  ;;  %p921_p2 = por %p920_p7, %p919_p11 }
  0x37   : > { %p922_p3 = pnand %p921_p2, %p915_p0 }
  0x39   : > { %925 = shalt.err (!%p922_p3)
}
  0x3a   : > { %s1509_s9 = smov 512   ;;  %s1510_s6 = smov 256  }
  0x3b   : > { %s1061_s27 = smov 16   ;;  %p252_p7 = scmp.lt.s32.totalorder %s1056_s24, 5 }
  0x3c   : > { %783 = dma.hbm_to_vmem [thread:$0]  (!%p1174_p10), %s1185_s28, 1024, %s1189_s29, %s1192_s5, %s1509_s9, %s1510_s6, %s1061_s27  }
  0x3d   : > { %p1527_p11 = scmp.ge.s32.totalorder %s1056_s24, 1  ;;  %s1529_s1 = sld [smem:[#allocation17_spill]] }
  0x3e   : > { %s189_s2 = scalar_lea.vmem [#allocation5], %s745_s8  ;;  %s755_s28 = sshll.u32 %s1160_s7, 5 }
  0x3f   : > { %p1228_p1 = pnand %p1527_p11, %p252_p7  ;;  %s199_s26 = sshll.u32 %s189_s2, 4  ;;  %s1241_s26 = int_to_ptr.vmem [resolvable:$true] %s199_s26 }
  0x40   : > { %s186_s29 = scalar_lea.sflag [#allocation6], %s1160_s7 }
  0x41   : > { %s1528_s15 = scalar_select %p1228_p1, 1, 0 }
  0x43   : > { %s1237_s0 = scalar_lea.hbm %s1529_s1, %s749_s14  ;;  %s931_s14 = scalar_lea.hbm %s1529_s1, 4096 }
  0x44   : > { %s926_s9 = scalar_lea.hbm %s1237_s0, 1024  ;;  %p932_p8 = scmp.lt.u32.totalorder %s1237_s0, %s1529_s1 }
  0x45   : > { %p927_p4 = scmp.ne.s32.totalorder %s1237_s0, %s926_s9  ;;  %p933_p9 = scmp.lt.u32.totalorder %s931_s14, %s926_s9 }
  0x46   : > { %p935_p0 = scmp.lt.u32.totalorder %s926_s9, %s1237_s0 }
  0x47   : > { %p929_p5 = pnand %p927_p4, %p1198_p13  ;;  %p934_p12 = por %p933_p9, %p932_p8 }
  0x49   : > { %p930_p6 = pneg %p929_p5  ;;  %p936_p2 = por %p935_p0, %p934_p12 }
  0x4b   : > { %p937_p3 = pnand %p936_p2, %p930_p6 }
  0x4d   : > { %940 = shalt.err (!%p937_p3)
}
  0x4e   : > { %s941_s2 = scalar_lea.vmem %s1241_s26, 1024  ;;  %s1062_s8 = smov [#allocation5]  }
  0x4f   : > { %p942_p7 = scmp.ne.s32.totalorder %s1241_s26, %s941_s2  ;;  %s946_s12 = sshll.u32 %s1062_s8, 4  ;;  %s947_s12 = int_to_ptr.vmem [resolvable:$false] %s946_s12 }
  0x50   : > { %s948_s6 = scalar_lea.vmem %s947_s12, 2048  ;;  %p949_p5 = scmp.lt.s32.totalorder %s1241_s26, %s947_s12 }
  0x51   : > { %p944_p11 = pnand %p942_p7, %p1198_p13  ;;  %p950_p1 = scmp.lt.s32.totalorder %s948_s6, %s941_s2 }
  0x53   : > { %p945_p4 = pneg %p944_p11  ;;  %p951_p8 = por %p950_p1, %p949_p5 }
  0x55   : > { %p952_p9 = pnand %p951_p8, %p945_p4 }
  0x57   : > { %955 = shalt.err (!%p952_p9)
}
  0x58   : > { %s1530_s9 = smov 256   ;;  %s1531_s16 = smov 512  }
  0x59   : > { %780 = dma.hbm_to_vmem [thread:$0]  (!%p1174_p10), %s1237_s0, 1024, %s1241_s26, %s186_s29, %s1531_s16, %s1530_s9, %s1061_s27  }
  0x5a   : > { %s757_s14 = sshll.u32 %s1052_s23, 3  ;;  %s1532_s17 = sshll.u32 %s1048_s22, 2 }
  0x5b   : > { %s243_s2 = sadd.s32 %s757_s14, %s1532_s17  ;;  %s237_s8 = scalar_lea.vmem [#allocation9], %s755_s28 }
  0x5c   : > { %s247_s12 = sshll.u32 %s237_s8, 4  ;;  %s758_s6 = sshll.u32 %s243_s2, 7  ;;  %s248_s12 = int_to_ptr.vmem [resolvable:$true] %s247_s12 }
  0x5d   : > { %s245_s11 = scalar_lea.hbm %s1503_s3, %s758_s6  ;;  %s961_s26 = scalar_lea.hbm %s1503_s3, 2048 }
  0x5e   : > { %s956_s19 = scalar_lea.hbm %s245_s11, 512  ;;  %p962_p0 = scmp.lt.u32.totalorder %s245_s11, %s1503_s3 }
  0x5f   : > { %p957_p1 = scmp.ne.s32.totalorder %s245_s11, %s956_s19  ;;  %p963_p2 = scmp.lt.u32.totalorder %s961_s26, %s956_s19 }
  0x60   : > { %p965_p7 = scmp.lt.u32.totalorder %s956_s19, %s245_s11 }
  0x61   : > { %p959_p6 = pnand %p957_p1, %p1198_p13  ;;  %p964_p3 = por %p963_p2, %p962_p0 }
  0x63   : > { %p960_p12 = pneg %p959_p6  ;;  %p966_p11 = por %p965_p7, %p964_p3 }
  0x65   : > { %p967_p4 = pnand %p966_p11, %p960_p12 }
  0x67   : > { %970 = shalt.err (!%p967_p4)
}
  0x68   : > { %s971_s1 = scalar_lea.vmem %s248_s12, 512  ;;  %s1063_s25 = smov [#allocation9]  }
  0x69   : > { %p972_p5 = scmp.ne.s32.totalorder %s248_s12, %s971_s1  ;;  %s976_s7 = sshll.u32 %s1063_s25, 4  ;;  %s977_s7 = int_to_ptr.vmem [resolvable:$false] %s976_s7 }
  0x6a   : > { %s978_s4 = scalar_lea.vmem %s977_s7, 1024  ;;  %p979_p1 = scmp.lt.s32.totalorder %s248_s12, %s977_s7 }
  0x6b   : > { %p974_p8 = pnand %p972_p5, %p1198_p13  ;;  %p980_p6 = scmp.lt.s32.totalorder %s978_s4, %s971_s1 }
  0x6d   : > { %p975_p9 = pneg %p974_p8  ;;  %p981_p10 = por %p980_p6, %p979_p1 }
  0x6f   : > { %p982_p0 = pnand %p981_p10, %p975_p9 }
  0x71   : > { %985 = shalt.err (!%p982_p0)
}
  0x72   : > { %p1533_p2 = scmp.ne.s32.totalorder %s1524_s13, 0  ;;  %p1534_p12 = scmp.ne.s32.totalorder %s1528_s15, 0 }
  0x73   : > { %s258_s19 = sand.u32 (!%p1534_p12), 1, %s1032_s18   ;;  %p1535_p13 = scmp.ne.s32.totalorder (!%p1534_p12), %s1522_s30, 0 }
  0x74   : > { %786 = dma.hbm_to_vmem [thread:$0]  (!%p1533_p2), %s245_s11, 512, %s248_s12, %s1192_s5  }
  0x75   : > { %256 = sbr.rel (%p1534_p12) target bundleno = 376 (0x178), region = 36  ;;  %s760_s20 = sshll.u32 (!%p1534_p12), %s258_s19, 6 }
  0x76   : > { %s259_s10 = scalar_lea.sflag (!%p1534_p12), [#allocation6], %s258_s19  ;;  %s1295_s28 = scalar_lea.vmem (!%p1534_p12), [#allocation5], %s760_s20 }
  0x7c   : > { %1019 = dma.done.wait (%p1535_p13), %s259_s10, 1024  }
  0x7d   : > { %1021 = vsyncadd (%p1535_p13), %s259_s10, 4294966272  ;;  %s1536_s29 = sadd.s32 4294967295, %s1056_s24   ;;  %s1303_s5 = scalar_lea.vmem [#allocation7], %s760_s20 }
  0x7e   : > { %s267_s13 = sand.u32 1, %s1536_s29  }
  0x7f   : > { %s268_s11 = scalar_lea.sflag [#allocation8], %s267_s13 }
  0x80   : > { %1023 = dma.done.wait (%p1535_p13), %s268_s11, 1536  }
  0x81   : > { %1025 = vsyncadd (%p1535_p13), %s268_s11, 4294965760  ;;  %s762_s15 = sshll.u32 %s258_s19, 5  ;;  %s763_s9 = sshll.u32 %s1044_s21, 2 }
  0x82   : > { %p321_p10 = scmp.lt.s32.totalorder %s763_s9, 7  ;;  %s1537_s2 = sld [smem:[#allocation19_spill]] }
  0x83   : > { %s280_s12 = scalar_lea.vmem [#allocation9], %s762_s15  ;;  %s1538_s6 = sld [smem:[#allocation13_spill]] }
  0x84   : > { %s1557_s9 = smov (!%p321_p10, %s763_s9), 7 }
  0x85   : > { %s764_s16 = sshll.u32 %s1557_s9, 3 }
  0x88   : > { %s1313_s8 = scalar_lea.vmem %s1537_s2, %s764_s16 }
  0x89   : > { %p765_p3 = scmp.ne.s32.totalorder %s1538_s6, 0 }
  0x8a   : > { %vm330_vm0 = vcmask (!%p765_p3), 7168   ;;  %v1064_v0 = vmov (!%p765_p3), 0.0  }
  0x8b   : > { %329 = sbr.rel (%p765_p3) target bundleno = 146 (0x92), region = 52  ;;  %331 = vst.msk [vmem:[#allocation2] sm:$0xff] (!%p765_p3), %vm330_vm0, %v1064_v0  ;;  %332 = vst.msk [vmem:[#allocation2 + $0x8] sm:$0xff] (!%p765_p3), %vm330_vm0, %v1064_v0 }
  0x8c   : > { %333 = vst.msk [vmem:[#allocation2 + $0x10] sm:$0xff] (!%p765_p3), %vm330_vm0, %v1064_v0  ;;  %334 = vst.msk [vmem:[#allocation2 + $0x18] sm:$0xff] (!%p765_p3), %vm330_vm0, %v1064_v0 }
  0x8d   : > { %335 = vst.msk [vmem:[#allocation3] sm:$0xff] (!%p765_p3), %vm330_vm0, %v1064_v0  ;;  %336 = vst.msk [vmem:[#allocation3 + $0x8] sm:$0xff] (!%p765_p3), %vm330_vm0, %v1064_v0 }
  0x8e   : > { %337 = vst.msk [vmem:[#allocation3 + $0x10] sm:$0xff] (!%p765_p3), %vm330_vm0, %v1064_v0  ;;  %338 = vst.msk [vmem:[#allocation3 + $0x18] sm:$0xff] (!%p765_p3), %vm330_vm0, %v1064_v0 }
  0x92 PF: > { %v1316_v1 = vld [vmem:[%s280_s12] sm:$0xff]  ;;  %v1318_v2 = vld [vmem:[%s280_s12 + $0x8] sm:$0xff]  ;;  %v1320_v3 = vld [vmem:[%s280_s12 + $0x10] sm:$0xff]  ;;  %s1363_s21 = sld [smem:[#allocation4]]  ;;  %vm549_vm1 = vcmask 7168   ;;  %s1539_s30 = sld [smem:[#allocation13_spill]] }
  0x93   : > { %v1322_v4 = vld [vmem:[%s280_s12 + $0x18] sm:$0xff]  ;;  %v395_v5 = vunpack.c.1.s8 %v1316_v1  ;;  %v396_v6 = vunpack.c.1.s8 %v1318_v2  ;;  %v397_v7 = vunpack.c.1.s8 %v1320_v3  ;;  %v391_v8 = vunpack.c.0.s8 %v1316_v1  ;;  %v1333_v13 = vld [vmem:[%s1295_s28 + $0x20] sm:$0xff]  ;;  %v1344_v18 = vld [vmem:[%s1295_s28 + $0x28] sm:$0xff] }
  0x94   : > { %v398_v9 = vunpack.c.1.s8 %v1322_v4  ;;  %v392_v10 = vunpack.c.0.s8 %v1318_v2  ;;  %v393_v11 = vunpack.c.0.s8 %v1320_v3  ;;  %v394_v12 = vunpack.c.0.s8 %v1322_v4  ;;  %v367_v19 = vld [vmem:[%s1303_s5 + $0x20] sm:$0xff]  ;;  %v368_v23 = vld [vmem:[%s1303_s5 + $0x28] sm:$0xff] }
  0x95   : > { %v1335_v14 = vcvt.s32.f32 %v395_v5  ;;  %v1337_v15 = vcvt.s32.f32 %v396_v6  ;;  %v1339_v16 = vcvt.s32.f32 %v397_v7  ;;  %v1341_v17 = vcvt.s32.f32 %v391_v8  ;;  %v339_v42 = vld [vmem:[%s1295_s28] sm:$0xff]  ;;  %v340_v49 = vld [vmem:[%s1295_s28 + $0x8] sm:$0xff]  ;;  %v1390_v8 = vld [vmem:[%s1295_s28 + $0x30] sm:$0xff] }
  0x96   : > { %v1347_v20 = vcvt.s32.f32 %v398_v9  ;;  %v1349_v21 = vcvt.s32.f32 %v392_v10  ;;  %v1351_v22 = vcvt.s32.f32 %v393_v11  ;;  %v1356_v25 = vcvt.s32.f32 %v394_v12  ;;  %v363_v54 = vld [vmem:[%s1303_s5] sm:$0xff]  ;;  %v364_v58 = vld [vmem:[%s1303_s5 + $0x8] sm:$0xff] }
  0x97   : > { %v563_v24 = vadd.f32 %v1337_v15, %v1335_v14  ;;  %v355_v26 = vunpack.c.l.bf16 %v1333_v13  ;;  %v356_v27 = vunpack.c.h.bf16 %v1333_v13  ;;  %v357_v29 = vunpack.c.l.bf16 %v1344_v18  ;;  %v369_v13 = vld [vmem:[%s1303_s5 + $0x30] sm:$0xff] }
  0x98   : > { %v558_v28 = vadd.f32 %v1349_v21, %v1341_v17  ;;  %v379_v30 = vunpack.c.l.bf16 %v367_v19  ;;  %v380_v31 = vunpack.c.h.bf16 %v367_v19  ;;  %v358_v33 = vunpack.c.h.bf16 %v1344_v18  ;;  %p766_p7 = scmp.ne.s32.totalorder %s1539_s30, 1 }
  0x99   : > { %v564_v32 = vadd.f32 %v563_v24, %v1339_v16  ;;  %v381_v34 = vunpack.c.l.bf16 %v368_v23  ;;  %v382_v35 = vunpack.c.h.bf16 %v368_v23  ;;  %v399_v37 = vunpack.c.2.s8 %v1316_v1 }
  0x9a   : > { %v559_v36 = vadd.f32 %v558_v28, %v1351_v22  ;;  %v400_v38 = vunpack.c.2.s8 %v1318_v2  ;;  %v431_v40 = vsub.f32 %v355_v26, %v379_v30  ;;  %v432_v41 = vsub.f32 %v356_v27, %v380_v31  ;;  %v1398_v28 = vld [vmem:[%s1295_s28 + $0x38] sm:$0xff] }
  0x9b   : > { %v565_v39 = vadd.f32 %v564_v32, %v1347_v20  ;;  %v401_v44 = vunpack.c.2.s8 %v1320_v3  ;;  %v433_v45 = vsub.f32 %v357_v29, %v381_v34  ;;  %v434_v46 = vsub.f32 %v358_v33, %v382_v35  ;;  %v370_v30 = vld [vmem:[%s1303_s5 + $0x38] sm:$0xff] }
  0x9c   : > { %v560_v43 = vadd.f32 %v559_v36, %v1356_v25  ;;  %v455_v47 = vmul.f32 1.442695, %v431_v40  ;;  %v457_v48 = vmul.f32 1.442695, %v432_v41  ;;  %v402_v50 = vunpack.c.2.s8 %v1322_v4 }
  0x9d   : > { %566 = vadd.xlane.f32.xlu1 %v565_v39  ;;  %v1376_v51 = vcvt.s32.f32 %v399_v37  ;;  %v1378_v52 = vcvt.s32.f32 %v400_v38  ;;  %v347_v53 = vunpack.c.l.bf16 %v339_v42  ;;  %v459_v55 = vmul.f32 1.442695, %v433_v45 }
  0x9e   : > { %561 = vadd.xlane.f32.xlu0 %v560_v43  ;;  %856 = vpow2.f32 %v455_v47  ;;  %v461_v56 = vmul.f32 1.442695, %v434_v46  ;;  %v348_v57 = vunpack.c.h.bf16 %v339_v42  ;;  %v1382_v59 = vcvt.s32.f32 %v401_v44 }
  0x9f   : > { %858 = vpow2.f32 %v457_v48  ;;  %v1385_v60 = vstv %s1363_s21  ;;  %v349_v61 = vunpack.c.l.bf16 %v340_v49  ;;  %v350_v62 = vunpack.c.h.bf16 %v340_v49 }
  0xa0   : > { %860 = vpow2.f32 %v459_v55  ;;  %v371_v63 = vunpack.c.l.bf16 %v363_v54  ;;  %v372_v0 = vunpack.c.h.bf16 %v363_v54  ;;  %v1387_v5 = vcvt.s32.f32 %v402_v50 }
  0xa1   : > { %862 = vpow2.f32 %v461_v56  ;;  %v373_v6 = vunpack.c.l.bf16 %v364_v58  ;;  %v374_v7 = vunpack.c.h.bf16 %v364_v58  ;;  %v481_v9 = vsub.f32 %v355_v26, %v1385_v60 }
  0xa2   : > { %v482_v10 = vsub.f32 %v356_v27, %v1385_v60  ;;  %v423_v11 = vsub.f32 %v347_v53, %v371_v63  ;;  %v424_v12 = vsub.f32 %v348_v57, %v372_v0  ;;  %v483_v18 = vsub.f32 %v357_v29, %v1385_v60 }
  0xa3   : > { %v484_v19 = vsub.f32 %v358_v33, %v1385_v60  ;;  %v425_v23 = vsub.f32 %v349_v61, %v373_v6  ;;  %v426_v24 = vsub.f32 %v350_v62, %v374_v7  ;;  %v359_v34 = vunpack.c.l.bf16 %v1390_v8  ;;  %v1419_v7 = vld [vmem:[%s1295_s28 + $0x10] sm:$0xff] }
  0xa4   : > { %v439_v31 = vmul.f32 1.442695, %v423_v11  ;;  %v441_v32 = vmul.f32 1.442695, %v424_v12  ;;  %v360_v26 = vunpack.c.h.bf16 %v1390_v8  ;;  %v473_v36 = vsub.f32 %v347_v53, %v1385_v60  ;;  %v1424_v11 = vld [vmem:[%s1295_s28 + $0x18] sm:$0xff] }
  0xa5   : > { %v443_v35 = vmul.f32 1.442695, %v425_v23  ;;  %v445_v27 = vmul.f32 1.442695, %v426_v24  ;;  %v383_v37 = vunpack.c.l.bf16 %v369_v13  ;;  %v361_v29 = vunpack.c.l.bf16 %v1398_v28 }
  0xa6   : > { %864 = vpow2.f32 %v439_v31  ;;  %v384_v33 = vunpack.c.h.bf16 %v369_v13  ;;  %v385_v38 = vunpack.c.l.bf16 %v370_v30  ;;  %v474_v39 = vsub.f32 %v348_v57, %v1385_v60  ;;  %v366_v31 = vld [vmem:[%s1303_s5 + $0x18] sm:$0xff] }
  0xa7   : > { %866 = vpow2.f32 %v441_v32  ;;  %v362_v40 = vunpack.c.h.bf16 %v1398_v28  ;;  %v386_v41 = vunpack.c.h.bf16 %v370_v30  ;;  %v475_v43 = vsub.f32 %v349_v61, %v1385_v60 }
  0xa8   : > { %v857_v42 = vpop.eup %856  ;;  %868 = vpow2.f32 %v443_v35  ;;  %v435_v44 = vsub.f32 %v359_v34, %v383_v37  ;;  %v436_v45 = vsub.f32 %v360_v26, %v384_v33  ;;  %v476_v48 = vsub.f32 %v350_v62, %v1385_v60 }
  0xa9   : > { %v859_v46 = vpop.eup %858  ;;  %v497_v47 = vmul.f32 %v857_v42, %v481_v9  ;;  %870 = vpow2.f32 %v445_v27  ;;  %v403_v49 = vunpack.c.3.s8 %v1316_v1  ;;  %v404_v54 = vunpack.c.3.s8 %v1318_v2 }
  0xaa   : > { %v861_v50 = vpop.eup %860  ;;  %v498_v53 = vmul.f32 %v859_v46, %v482_v10  ;;  %v405_v55 = vunpack.c.3.s8 %v1320_v3  ;;  %v437_v56 = vsub.f32 %v361_v29, %v385_v38  ;;  %v438_v62 = vsub.f32 %v362_v40, %v386_v41 }
  0xab   : > { %v863_v57 = vpop.eup %862  ;;  %v499_v58 = vmul.f32 %v861_v50, %v483_v18  ;;  %v517_v61 = vmul.f32 %v497_v47, %v1376_v51  ;;  %v463_v63 = vmul.f32 1.442695, %v435_v44  ;;  %v465_v6 = vmul.f32 1.442695, %v436_v45 }
  0xac   : > { %v500_v1 = vmul.f32 %v863_v57, %v484_v19  ;;  %v518_v0 = vmul.f32 %v498_v53, %v1378_v52  ;;  %v467_v2 = vmul.f32 1.442695, %v437_v56  ;;  %v406_v9 = vunpack.c.3.s8 %v1322_v4  ;;  %v365_v19 = vld [vmem:[%s1303_s5 + $0x10] sm:$0xff] }
  0xad   : > { %v519_v8 = vmul.f32 %v499_v58, %v1382_v59  ;;  %872 = vpow2.f32 %v463_v63  ;;  %v469_v10 = vmul.f32 1.442695, %v438_v62  ;;  %v419_v18 = vcvt.s32.f32 %v403_v49 }
  0xae   : > { %v520_v12 = vmul.f32 %v500_v1, %v1387_v5  ;;  %v535_v13 = vadd.f32 %v518_v0, %v517_v61  ;;  %874 = vpow2.f32 %v465_v6  ;;  %v485_v23 = vsub.f32 %v359_v34, %v1385_v60 }
  0xaf   : > { %876 = vpow2.f32 %v467_v2  ;;  %v486_v24 = vsub.f32 %v360_v26, %v1385_v60  ;;  %v351_v30 = vunpack.c.l.bf16 %v1419_v7  ;;  %v352_v35 = vunpack.c.h.bf16 %v1419_v7 }
  0xb0   : > { %v865_v32 = vpop.eup %864  ;;  %v536_v4 = vadd.f32 %v535_v13, %v519_v8  ;;  %878 = vpow2.f32 %v469_v10  ;;  %v353_v27 = vunpack.c.l.bf16 %v1424_v11  ;;  %v354_v38 = vunpack.c.h.bf16 %v1424_v11 }
  0xb1   : > { %v867_v37 = vpop.eup %866  ;;  %v489_v33 = vmul.f32 %v865_v32, %v473_v36  ;;  %v375_v41 = vunpack.c.l.bf16 %v365_v19  ;;  %v376_v42 = vunpack.c.h.bf16 %v365_v19  ;;  %v377_v26 = vunpack.c.l.bf16 %v366_v31 }
  0xb2   : > { %v869_v44 = vpop.eup %868  ;;  %v537_v34 = vadd.f32 %v536_v4, %v520_v12  ;;  %v490_v45 = vmul.f32 %v867_v37, %v474_v39  ;;  %v378_v46 = vunpack.c.h.bf16 %v366_v31  ;;  %v487_v39 = vsub.f32 %v361_v29, %v1385_v60 }
  0xb3   : > { %v871_v47 = vpop.eup %870  ;;  %v491_v49 = vmul.f32 %v869_v44, %v475_v43  ;;  %v509_v50 = vmul.f32 %v489_v33, %v1341_v17  ;;  %v427_v53 = vsub.f32 %v351_v30, %v375_v41  ;;  %v428_v56 = vsub.f32 %v352_v35, %v376_v42 }
  0xb4   : > { %538 = vadd.xlane.f32.xlu1 %v537_v34  ;;  %v492_v57 = vmul.f32 %v871_v47, %v476_v48  ;;  %v510_v58 = vmul.f32 %v490_v45, %v1349_v21  ;;  %v429_v36 = vsub.f32 %v353_v27, %v377_v26  ;;  %v430_v61 = vsub.f32 %v354_v38, %v378_v46 }
  0xb5   : > { %v511_v62 = vmul.f32 %v491_v49, %v1351_v22  ;;  %v447_v63 = vmul.f32 1.442695, %v427_v53  ;;  %v449_v1 = vmul.f32 1.442695, %v428_v56  ;;  %v420_v7 = vcvt.s32.f32 %v404_v54 }
  0xb6   : > { %v512_v43 = vmul.f32 %v492_v57, %v1356_v25  ;;  %v525_v0 = vadd.f32 %v510_v58, %v509_v50  ;;  %v451_v17 = vmul.f32 1.442695, %v429_v36  ;;  %v453_v6 = vmul.f32 1.442695, %v430_v61  ;;  %v554_v36 = vld [vmem:[#allocation3] sm:$0xff] }
  0xb7   : > { %v873_v2 = vpop.eup %872  ;;  %v488_v21 = vsub.f32 %v362_v40, %v1385_v60  ;;  %880 = vpow2.f32 %v447_v63  ;;  %v421_v8 = vcvt.s32.f32 %v405_v55  ;;  %v422_v11 = vcvt.s32.f32 %v406_v9  ;;  %v508_v63 = vld [vmem:[#allocation2 + $0x18] sm:$0xff] }
  0xb8   : > { %v875_v48 = vpop.eup %874  ;;  %v526_v22 = vadd.f32 %v525_v0, %v511_v62  ;;  %v501_v29 = vmul.f32 %v873_v2, %v485_v23  ;;  %882 = vpow2.f32 %v449_v1  ;;  %v573_v40 = vadd.f32 %v420_v7, %v419_v18  ;;  %v557_v0 = vld [vmem:[#allocation3 + $0x18] sm:$0xff]  ;;  %v506_v2 = vld [vmem:[#allocation2 + $0x8] sm:$0xff] }
  0xb9   : > { %v877_v10 = vpop.eup %876  ;;  %v502_v25 = vmul.f32 %v875_v48, %v486_v24  ;;  %884 = vpow2.f32 %v451_v17  ;;  %v477_v3 = vsub.f32 %v351_v30, %v1385_v60  ;;  %v478_v23 = vsub.f32 %v352_v35, %v1385_v60  ;;  %v556_v48 = vld [vmem:[#allocation3 + $0x10] sm:$0xff] }
  0xba   : > { %v879_v12 = vpop.eup %878  ;;  %v527_v13 = vadd.f32 %v526_v22, %v512_v43  ;;  %v503_v19 = vmul.f32 %v877_v10, %v487_v39  ;;  %v521_v54 = vmul.f32 %v501_v29, %v419_v18  ;;  %886 = vpow2.f32 %v453_v6 }
  0xbb   : > { %v504_v31 = vmul.f32 %v879_v12, %v488_v21  ;;  %v522_v28 = vmul.f32 %v502_v25, %v420_v7  ;;  %v574_v9 = vadd.f32 %v573_v40, %v421_v8  ;;  %v479_v24 = vsub.f32 %v353_v27, %v1385_v60 }
  0xbc   : > { %528 = vadd.xlane.f32.xlu0 %v527_v13  ;;  %v523_v32 = vmul.f32 %v503_v19, %v421_v8  ;;  %v480_v42 = vsub.f32 %v354_v38, %v1385_v60  ;;  %v568_v27 = vadd.f32 %v1378_v52, %v1376_v51 }
  0xbd   : > { %v524_v4 = vmul.f32 %v504_v31, %v422_v11  ;;  %v540_v37 = vadd.f32 %v522_v28, %v521_v54  ;;  %v575_v26 = vadd.f32 %v574_v9, %v422_v11 }
  0xbe   : > { %v569_v56 = vadd.f32 %v568_v27, %v1382_v59  ;;  %v505_v59 = vld [vmem:[#allocation2] sm:$0xff] }
  0xbf   : > { %v541_v55 = vadd.f32 %v540_v37, %v523_v32 }
  0xc0   : > { %v570_v58 = vadd.f32 %v569_v56, %v1387_v5 }
  0xc1   : > { %v881_v33 = vpop.eup %880  ;;  %v542_v41 = vadd.f32 %v541_v55, %v524_v4 }
  0xc2   : > { %v883_v44 = vpop.eup %882  ;;  %v493_v34 = vmul.f32 %v881_v33, %v477_v3 }
  0xc3   : > { %v885_v45 = vpop.eup %884  ;;  %543 = vadd.xlane.f32.xlu1 %v542_v41  ;;  %v494_v18 = vmul.f32 %v883_v44, %v478_v23 }
  0xc4   : > { %v887_v46 = vpop.eup %886  ;;  %v495_v47 = vmul.f32 %v885_v45, %v479_v24  ;;  %v513_v30 = vmul.f32 %v493_v34, %v1335_v14  ;;  %v555_v14 = vld [vmem:[#allocation3 + $0x8] sm:$0xff] }
  0xc5   : > { %v496_v49 = vmul.f32 %v887_v46, %v480_v42  ;;  %v514_v35 = vmul.f32 %v494_v18, %v1337_v15 }
  0xc6   : > { %v515_v50 = vmul.f32 %v495_v47, %v1339_v16  ;;  %v507_v16 = vld [vmem:[#allocation2 + $0x10] sm:$0xff] }
  0xc7   : > { %v516_v60 = vmul.f32 %v496_v49, %v1347_v20  ;;  %v530_v38 = vadd.f32 %v514_v35, %v513_v30  ;;  %576 = vadd.xlane.f32.xlu1 %v575_v26 }
  0xc9   : > { %v531_v53 = vadd.f32 %v530_v38, %v515_v50 }
  0xcb   : > { %v532_v57 = vadd.f32 %v531_v53, %v516_v60 }
  0xcd   : > { %533 = vadd.xlane.f32.xlu0 %v532_v57 }
  0xd1   : > { %571 = vadd.xlane.f32.xlu0 %v570_v58 }
 0x12a   : > { %v567_v15 = vpop.xlane.xlu1 %566 }
 0x12b   : > { %v579_v61 = vadd.f32 %v567_v15, %v555_v14  ;;  %v562_v51 = vpop.xlane.xlu0 %561 }
 0x12c   : > { %v578_v52 = vadd.f32 %v562_v51, %v554_v36 }
 0x12d   : > { %583 = vst.msk [vmem:[#allocation3 + $0x8] sm:$0xff] %vm549_vm1, %v579_v61 }
 0x12e   : > { %582 = vst.msk [vmem:[#allocation3] sm:$0xff] %vm549_vm1, %v578_v52 }
 0x134   : > { %v595_v10 = vld [vmem:[#allocation3 + $0x8] sm:$0xff] (!%p766_p7) }
 0x135   : > { %v594_v29 = vld [vmem:[#allocation3] sm:$0xff] (!%p766_p7) }
 0x136   : > { %888 = vrcp.f32 (!%p766_p7), %v594_v29 }
 0x137   : > { %890 = vrcp.f32 (!%p766_p7), %v595_v10 }
 0x140   : > { %v889_v19 = vpop.eup (!%p766_p7), %888 }
 0x141   : > { %v539_v20 = vpop.xlane.xlu1 %538  ;;  %v891_v31 = vpop.eup (!%p766_p7), %890 }
 0x142   : > { %v547_v62 = vadd.f32 %v539_v20, %v507_v16 }
 0x144   : > { %552 = vst.msk [vmem:[#allocation2 + $0x10] sm:$0xff] %vm549_vm1, %v547_v62 }
 0x149   : > { %v529_v39 = vpop.xlane.xlu0 %528 }
 0x14a   : > { %v545_v5 = vadd.f32 %v529_v39, %v505_v59 }
 0x14b   : > { %v592_v54 = vld [vmem:[#allocation2 + $0x10] sm:$0xff] (!%p766_p7) }
 0x14c   : > { %550 = vst.msk [vmem:[#allocation2] sm:$0xff] %vm549_vm1, %v545_v5 }
 0x150   : > { %v544_v1 = vpop.xlane.xlu1 %543 }
 0x151   : > { %v548_v43 = vadd.f32 %v544_v1, %v508_v63 }
 0x153   : > { %553 = vst.msk [vmem:[#allocation2 + $0x18] sm:$0xff] %vm549_vm1, %v548_v43  ;;  %v590_v12 = vld [vmem:[#allocation2] sm:$0xff] (!%p766_p7) }
 0x154   : > { %v577_v17 = vpop.xlane.xlu1 %576  ;;  %v599_v28 = vmul.f32 (!%p766_p7), %v889_v19, %v590_v12 }
 0x155   : > { %v581_v6 = vadd.f32 %v577_v17, %v557_v0 }
 0x156   : > { %606 = vst.msk [vmem:[%s1313_s8] sm:$0xff] (!%p766_p7), %vm549_vm1, %v599_v28 }
 0x157   : > { %585 = vst.msk [vmem:[#allocation3 + $0x18] sm:$0xff] %vm549_vm1, %v581_v6 }
 0x15a   : > { %v534_v7 = vpop.xlane.xlu0 %533  ;;  %v593_v40 = vld [vmem:[#allocation2 + $0x18] sm:$0xff] (!%p766_p7) }
 0x15b   : > { %v546_v21 = vadd.f32 %v534_v7, %v506_v2  ;;  %589 = sbr.rel (%p766_p7) target bundleno = 376 (0x178), region = 56 }
 0x15d   : > { %551 = vst.msk [vmem:[#allocation2 + $0x8] sm:$0xff] %vm549_vm1, %v546_v21 }
 0x15e   : > { %v572_v22 = vpop.xlane.xlu0 %571  ;;  %v597_v25 = vld [vmem:[#allocation3 + $0x18] sm:$0xff] (!%p766_p7) }
 0x15f   : > { %v580_v8 = vadd.f32 %v572_v22, %v556_v48 }
 0x161   : > { %584 = vst.msk [vmem:[#allocation3 + $0x10] sm:$0xff] %vm549_vm1, %v580_v8 }
 0x164   : > { %v591_v13 = vld [vmem:[#allocation2 + $0x8] sm:$0xff] }
 0x165   : > { %v601_v4 = vmul.f32 %v891_v31, %v591_v13 }
 0x167   : > { %607 = vst.msk [vmem:[%s1313_s8 + $0x8] sm:$0xff] %vm549_vm1, %v601_v4 }
 0x168   : > { %v596_v11 = vld [vmem:[#allocation3 + $0x10] sm:$0xff] }
 0x169   : > { %892 = vrcp.f32 %v596_v11 }
 0x16a   : > { %894 = vrcp.f32 %v597_v25 }
 0x173   : > { %v893_v32 = vpop.eup %892 }
 0x174   : > { %v895_v37 = vpop.eup %894  ;;  %v603_v3 = vmul.f32 %v893_v32, %v592_v54 }
 0x175   : > { %v605_v55 = vmul.f32 %v895_v37, %v593_v40 }
 0x176   : > { %608 = vst.msk [vmem:[%s1313_s8 + $0x10] sm:$0xff] %vm549_vm1, %v603_v3 }
 0x177   : > { %609 = vst.msk [vmem:[%s1313_s8 + $0x18] sm:$0xff] %vm549_vm1, %v605_v55 }
 0x178 PF: > { %s21_s24 = sadd.s32 1, %s1056_s24   ;;  %s1540_s26 = sld [smem:[#allocation12_spill]] }
 0x179   : > { %p18_p11 = scmp.ge.s32.totalorder %s21_s24, 6   ;;  %s1541_s19 = sld [smem:[#allocation16_spill]] }
 0x17a   : > { %s1542_s27 = sld [smem:[#allocation14_spill]]  ;;  %s1543_s0 = sld [smem:[#allocation15_spill]] }
 0x17b   : > { %s1544_s17 = smov %s1032_s18  ;;  %s1546_s20 = smov %s1048_s22 }
 0x17c   : > { %s1547_s21 = smov %s1052_s23  ;;  %20 = sbr.rel (!%p18_p11) target bundleno = 12 (0xc), region = 108 }
 0x17e   : > { %s1545_s18 = smov %s1540_s26 }
 0x180   : > { %s1548_s22 = smov %s1542_s27  ;;  %s1549_s23 = smov %s1543_s0 }
 0x183   :  { %632 = vsyncpa [#allocation6], 1 }
 0x184   :  { %634 = vsyncpa [#allocation6 + $0x1], 1 }
 0x185   :  { %635 = vsyncpa [#allocation8], 1 }
 0x186   :  { %637 = vsyncpa [#allocation8 + $0x1], 1 }

</bundles_post_ra>
